<compile_context>
chip_gen: v6e
topology: v6e:2x2x1
jax: 0.10.0
libtpu: 0.0.40
codegen_flags: <defaults>
</compile_context>

<pallas_src>
import jax
import jax.numpy as jnp
from jax.experimental import pallas as pl
from jax.experimental.pallas import tpu as pltpu


def _pick_h_tile(h, w, bytes_per_row_elem, sub_unit, step_bytes):
    """Largest h-tile that (a) divides h, (b) is a multiple of the sublane
    unit (or equals h), and (c) keeps one pipeline step under step_bytes."""
    max_rows = max(sub_unit, step_bytes // max(1, w * bytes_per_row_elem))
    if h <= max_rows:
        return h                     # full-h block (legal even if h % 8 != 0)
    best = None
    d = sub_unit
    limit = min(h - 1, max_rows)
    while d <= limit:
        if h % d == 0:
            best = d
        d += sub_unit
    return best if best is not None else h   # fallback: single full-h block


def _reg_pos_kernel(pred_ref, lab_ref, out_ref, loss_acc, mask_acc):
    j = pl.program_id(2)             # reduction axis (innermost)

    @pl.when(j == 0)
    def _init():
        loss_acc[...] = jnp.zeros_like(loss_acc)
        mask_acc[...] = jnp.zeros_like(mask_acc)

    p = pred_ref[0, 0].astype(jnp.float32)   # pred channel 0, (h_tile, w)
    t = lab_ref[0, 0].astype(jnp.float32)    # label channel 0 (target height)
    m = lab_ref[0, 1].astype(jnp.float32)    # label channel 1 (positive mask)

    # |p/(t+eps) - t/(t+eps)| == |p - t| / (t + eps): one divide per element.
    l1 = m * (jnp.abs(p - t) / (t + jnp.float32(1e-10)))

    ht, w = p.shape
    if loss_acc.shape[0] != ht:
        # Fold 8-row groups (matches the native (8,128) tile, layout-free)
        # so the accumulator stays (8, w) instead of (h_tile, w).
        l1 = jnp.sum(l1.reshape(ht // 8, 8, w), axis=0)
        m = jnp.sum(m.reshape(ht // 8, 8, w), axis=0)
    loss_acc[...] += l1
    mask_acc[...] += m

    @pl.when(j == pl.num_programs(2) - 1)
    def _finalize():
        out_ref[0, 0] = jnp.full((8, 128), jnp.sum(loss_acc[...]), jnp.float32)
        out_ref[0, 1] = jnp.full((8, 128), jnp.sum(mask_acc[...]), jnp.float32)


def reg_pos(h_pred, h_label, *, step_bytes=6 << 20):
    """h_pred: (N, C_pred, H, W), h_label: (N, C_lab>=2, H, W) -> scalar f32.

    Works directly on the NCHW layout (no pad / slice / reshape copies);
    f32 or bf16 inputs accepted (math and accumulation in f32)."""
    n, c_pred, h, w = h_pred.shape
    nl, c_lab, hl, wl = h_label.shape
    assert (n, h, w) == (nl, hl, wl), "pred/label spatial shapes must match"
    assert c_lab >= 2, "h_label needs at least 2 channels (target, mask)"

    pred_isz = h_pred.dtype.itemsize
    lab_isz = h_label.dtype.itemsize
    bytes_per_row_elem = pred_isz + 2 * lab_isz          # 3 channel-planes/step
    sub_unit = max(8, 32 // min(pred_isz, lab_isz))      # 8 (f32) / 16 (bf16)

    h_tile = _pick_h_tile(h, w, bytes_per_row_elem, sub_unit, step_bytes)
    h_blocks = h // h_tile
    # Second "parallel" axis so both v7x TensorCores get work even when n==1.
    n_chunks = 2 if (h_blocks % 2 == 0 and h_blocks >= 2) else 1
    bpc = h_blocks // n_chunks

    acc_rows = 8 if h_tile % 8 == 0 else h_tile          # folded accumulator rows

    pred_spec = pl.BlockSpec((1, 1, h_tile, w),
                             lambda i, c, j: (i, 0, c * bpc + j, 0))
    lab_spec = pl.BlockSpec((1, 2, h_tile, w),
                            lambda i, c, j: (i, 0, c * bpc + j, 0))
    # Lane-dense (8,128) output slab per (image, chunk) partial.
    out_spec = pl.BlockSpec((1, 2, 8, 128),
                            lambda i, c, j: (i * n_chunks + c, 0, 0, 0))

    elems = n * h * w
    cost = pl.CostEstimate(
        flops=6 * elems,
        transcendentals=elems,
        bytes_accessed=elems * bytes_per_row_elem + n * n_chunks * 2 * 8 * 128 * 4,
    )

    # Explicit scoped-VMEM limit: double-buffered input blocks + accumulators
    # + output, with headroom.  Keeps the big-tile config valid on v5e's
    # 16 MiB default and well under v7x's 64 MiB physical VMEM.
    vmem_need = (2 * bytes_per_row_elem * h_tile * w
                 + 2 * 4 * acc_rows * w
                 + 2 * 2 * 8 * 128 * 4)
    vmem_limit = int(min(max(vmem_need + (8 << 20), 32 << 20), 128 << 20))

    partials = pl.pallas_call(
        _reg_pos_kernel,
        out_shape=jax.ShapeDtypeStruct((n * n_chunks, 2, 8, 128), jnp.float32),
        grid_spec=pltpu.PrefetchScalarGridSpec(
            num_scalar_prefetch=0,
            grid=(n, n_chunks, bpc),
            in_specs=[pred_spec, lab_spec],
            out_specs=out_spec,
            scratch_shapes=[pltpu.VMEM((acc_rows, w), jnp.float32),
                            pltpu.VMEM((acc_rows, w), jnp.float32)],
        ),
        compiler_params=pltpu.CompilerParams(
            dimension_semantics=("parallel", "parallel", "arbitrary"),
            vmem_limit_bytes=vmem_limit),
        cost_estimate=cost,
    )(h_pred, h_label)

    loss_total = jnp.sum(partials[:, 0, 0, 0])
    mask_total = jnp.sum(partials[:, 1, 0, 0])
    return loss_total / jnp.maximum(jnp.float32(1.0), mask_total)


def _reference(h_pred, h_label):
    t = h_label[:, 0].astype(jnp.float32)
    m = h_label[:, 1].astype(jnp.float32)
    p = h_pred[:, 0].astype(jnp.float32)
    l1 = m * jnp.abs(p / (t + 1e-10) - t / (t + 1e-10))
    return jnp.sum(l1) / jnp.maximum(1.0, jnp.sum(m))


def _make_inputs(key, n, c_pred, c_lab, h, w, dtype=jnp.float32):
    k1, k2, k3 = jax.random.split(key, 3)
    h_pred = jax.random.normal(k1, (n, c_pred, h, w), dtype=jnp.float32)
    heights = jax.random.uniform(k2, (n, 1, h, w), minval=0.1, maxval=5.0)
    mask = (jax.random.uniform(k3, (n, c_lab - 1, h, w)) > 0.5).astype(jnp.float32)
    h_label = jnp.concatenate([heights, mask], axis=1)
    return h_pred.astype(dtype), h_label.astype(dtype)


def _check(loss, pred, label, name):
    jax.block_until_ready(loss)
    ref = _reference(pred, label)
    assert jnp.allclose(loss, ref, rtol=1e-5, atol=1e-5), (name, loss, ref)


if __name__ == "__main__":
    key = jax.random.PRNGKey(0)
    k1, k2, k3, k4 = jax.random.split(key, 4)

    # Case 1: small spatial (16x16), narrow lanes, single h-block.
    p1, lab1 = _make_inputs(k1, 2, 4, 2, 16, 16)
    _check(reg_pos(p1, lab1), p1, lab1, "case1")

    # Case 2: forced-small step budget -> multiple h-blocks per image,
    # exercising the accumulator sweep and the 2-chunk parallel axis.
    p2, lab2 = _make_inputs(k2, 2, 2, 2, 64, 64)
    _check(reg_pos(p2, lab2, step_bytes=16 * 1024), p2, lab2, "case2")

    # Case 3: ragged spatial size (h not a multiple of 8, w not of 128) —
    # handled copy-free with a full-extent block, no padding anywhere.
    p3, lab3 = _make_inputs(k3, 3, 1, 2, 30, 40)
    _check(reg_pos(p3, lab3), p3, lab3, "case3")

    # Case 4: bf16 inputs (half the HBM bytes), n == 1; f32 accumulation.
    p4, lab4 = _make_inputs(k4, 1, 2, 2, 32, 128, dtype=jnp.bfloat16)
    _check(reg_pos(p4, lab4), p4, lab4, "case4")

    print("KERNEL_OK")
</pallas_src>

<mosaic_0001>
module attributes {stable_mosaic.version = 11 : i64} {
  func.func @_reg_pos_kernel(%arg0: i32, %arg1: i32, %arg2: i32, %arg3: memref<1x1x16x16xf32, #tpu.memory_space<vmem>>, %arg4: memref<1x2x16x16xf32, #tpu.memory_space<vmem>>, %arg5: memref<1x2x8x128xf32, #tpu.memory_space<vmem>>, %arg6: memref<8x16xf32, #tpu.memory_space<vmem>>, %arg7: memref<8x16xf32, #tpu.memory_space<vmem>>) attributes {dimension_semantics = [#tpu.dimension_semantics<parallel>, #tpu.dimension_semantics<parallel>, #tpu.dimension_semantics<arbitrary>], iteration_bounds = array<i64: 2, 1, 1>, scalar_prefetch = 0 : i64, scratch_operands = 2 : i64, tpu.core_type = #tpu.core_type<tc>, window_params = [{transform_indices = @transform_0, window_bounds = array<i64: 1, 1, 16, 16>}, {transform_indices = @transform_1, window_bounds = array<i64: 1, 2, 16, 16>}, {transform_indices = @transform_2, window_bounds = array<i64: 1, 2, 8, 128>}]} {
    %c0_i32 = arith.constant 0 : i32
    %0 = arith.cmpi eq, %arg2, %c0_i32 : i32
    %1 = arith.extui %0 : i1 to i32
    %c0_i32_0 = arith.constant 0 : i32
    %2 = arith.cmpi ne, %1, %c0_i32_0 : i32
    scf.if %2 {
      %cst_23 = arith.constant 0.000000e+00 : f32
      %28 = vector.broadcast %cst_23 : f32 to vector<8x16xf32>
      %c0_24 = arith.constant 0 : index
      %c0_25 = arith.constant 0 : index
      %29 = vector.load %arg6[%c0_24, %c0_25] : memref<8x16xf32, #tpu.memory_space<vmem>>, vector<8x16xf32>
      tpu.vector_store %arg6[%c0_24, %c0_25], %28 {strides = array<i32>} : memref<8x16xf32, #tpu.memory_space<vmem>>, vector<8x16xf32>,
      %cst_26 = arith.constant 0.000000e+00 : f32
      %30 = vector.broadcast %cst_26 : f32 to vector<8x16xf32>
      %c0_27 = arith.constant 0 : index
      %c0_28 = arith.constant 0 : index
      %31 = vector.load %arg7[%c0_27, %c0_28] : memref<8x16xf32, #tpu.memory_space<vmem>>, vector<8x16xf32>
      tpu.vector_store %arg7[%c0_27, %c0_28], %30 {strides = array<i32>} : memref<8x16xf32, #tpu.memory_space<vmem>>, vector<8x16xf32>,
    } else {
    }
    %c0 = arith.constant 0 : index
    %c0_1 = arith.constant 0 : index
    %c0_2 = arith.constant 0 : index
    %c0_3 = arith.constant 0 : index
    %3 = vector.load %arg3[%c0, %c0_1, %c0_2, %c0_3] : memref<1x1x16x16xf32, #tpu.memory_space<vmem>>, vector<1x1x16x16xf32>
    %4 = vector.shape_cast %3 : vector<1x1x16x16xf32> to vector<16x16xf32>
    %c0_4 = arith.constant 0 : index
    %c0_5 = arith.constant 0 : index
    %c0_6 = arith.constant 0 : index
    %c0_7 = arith.constant 0 : index
    %5 = vector.load %arg4[%c0_4, %c0_5, %c0_6, %c0_7] : memref<1x2x16x16xf32, #tpu.memory_space<vmem>>, vector<1x1x16x16xf32>
    %6 = vector.shape_cast %5 : vector<1x1x16x16xf32> to vector<16x16xf32>
    %c0_8 = arith.constant 0 : index
    %c1 = arith.constant 1 : index
    %c0_9 = arith.constant 0 : index
    %c0_10 = arith.constant 0 : index
    %7 = vector.load %arg4[%c0_8, %c1, %c0_9, %c0_10] : memref<1x2x16x16xf32, #tpu.memory_space<vmem>>, vector<1x1x16x16xf32>
    %8 = vector.shape_cast %7 : vector<1x1x16x16xf32> to vector<16x16xf32>
    %9 = arith.subf %4, %6 : vector<16x16xf32>
    %10 = math.absf %9 : vector<16x16xf32>
    %cst = arith.constant 1.000000e-10 : f32
    %11 = vector.broadcast %cst : f32 to vector<16x16xf32>
    %12 = arith.addf %6, %11 : vector<16x16xf32>
    %13 = arith.divf %10, %12 : vector<16x16xf32>
    %14 = arith.mulf %8, %13 : vector<16x16xf32>
    %15 = vector.shape_cast %14 : vector<16x16xf32> to vector<2x8x16xf32>
    %cst_11 = arith.constant dense<0.000000e+00> : vector<8x16xf32>
    %16 = vector.multi_reduction <add>, %15, %cst_11 [0] : vector<2x8x16xf32> to vector<8x16xf32>
    %17 = vector.shape_cast %8 : vector<16x16xf32> to vector<2x8x16xf32>
    %cst_12 = arith.constant dense<0.000000e+00> : vector<8x16xf32>
    %18 = vector.multi_reduction <add>, %17, %cst_12 [0] : vector<2x8x16xf32> to vector<8x16xf32>
    %c0_13 = arith.constant 0 : index
    %c0_14 = arith.constant 0 : index
    %19 = vector.load %arg6[%c0_13, %c0_14] : memref<8x16xf32, #tpu.memory_space<vmem>>, vector<8x16xf32>
    %20 = arith.addf %19, %16 : vector<8x16xf32>
    %c0_15 = arith.constant 0 : index
    %c0_16 = arith.constant 0 : index
    %21 = vector.load %arg6[%c0_15, %c0_16] : memref<8x16xf32, #tpu.memory_space<vmem>>, vector<8x16xf32>
    tpu.vector_store %arg6[%c0_15, %c0_16], %20 {strides = array<i32>} : memref<8x16xf32, #tpu.memory_space<vmem>>, vector<8x16xf32>,
    %c0_17 = arith.constant 0 : index
    %c0_18 = arith.constant 0 : index
    %22 = vector.load %arg7[%c0_17, %c0_18] : memref<8x16xf32, #tpu.memory_space<vmem>>, vector<8x16xf32>
    %23 = arith.addf %22, %18 : vector<8x16xf32>
    %c0_19 = arith.constant 0 : index
    %c0_20 = arith.constant 0 : index
    %24 = vector.load %arg7[%c0_19, %c0_20] : memref<8x16xf32, #tpu.memory_space<vmem>>, vector<8x16xf32>
    tpu.vector_store %arg7[%c0_19, %c0_20], %23 {strides = array<i32>} : memref<8x16xf32, #tpu.memory_space<vmem>>, vector<8x16xf32>,
    %c0_i32_21 = arith.constant 0 : i32
    %25 = arith.cmpi eq, %arg2, %c0_i32_21 : i32
    %26 = arith.extui %25 : i1 to i32
    %c0_i32_22 = arith.constant 0 : i32
    %27 = arith.cmpi ne, %26, %c0_i32_22 : i32
    scf.if %27 {
      %c0_23 = arith.constant 0 : index
      %c0_24 = arith.constant 0 : index
      %28 = vector.load %arg6[%c0_23, %c0_24] : memref<8x16xf32, #tpu.memory_space<vmem>>, vector<8x16xf32>
      %29 = vector.shape_cast %28 : vector<8x16xf32> to vector<1x8x16xf32>
      %cst_25 = arith.constant dense<0.000000e+00> : vector<1xf32>
      %30 = vector.multi_reduction <add>, %29, %cst_25 [1, 2] : vector<1x8x16xf32> to vector<1xf32>
      %31 = vector.shape_cast %30 : vector<1xf32> to vector<1x1x1xf32>
      %32 = vector.extract %31[0, 0, 0] : f32 from vector<1x1x1xf32>
      %33 = vector.broadcast %32 : f32 to vector<8x128xf32>
      %c0_26 = arith.constant 0 : index
      %c0_27 = arith.constant 0 : index
      %c0_28 = arith.constant 0 : index
      %c0_29 = arith.constant 0 : index
      %34 = vector.load %arg5[%c0_26, %c0_27, %c0_28, %c0_29] : memref<1x2x8x128xf32, #tpu.memory_space<vmem>>, vector<1x1x8x128xf32>
      %35 = vector.shape_cast %34 : vector<1x1x8x128xf32> to vector<8x128xf32>
      %36 = vector.shape_cast %33 : vector<8x128xf32> to vector<1x1x8x128xf32>
      tpu.vector_store %arg5[%c0_26, %c0_27, %c0_28, %c0_29], %36 {strides = array<i32>} : memref<1x2x8x128xf32, #tpu.memory_space<vmem>>, vector<1x1x8x128xf32>,
      %c0_30 = arith.constant 0 : index
      %c0_31 = arith.constant 0 : index
      %37 = vector.load %arg7[%c0_30, %c0_31] : memref<8x16xf32, #tpu.memory_space<vmem>>, vector<8x16xf32>
      %38 = vector.shape_cast %37 : vector<8x16xf32> to vector<1x8x16xf32>
      %cst_32 = arith.constant dense<0.000000e+00> : vector<1xf32>
      %39 = vector.multi_reduction <add>, %38, %cst_32 [1, 2] : vector<1x8x16xf32> to vector<1xf32>
      %40 = vector.shape_cast %39 : vector<1xf32> to vector<1x1x1xf32>
      %41 = vector.extract %40[0, 0, 0] : f32 from vector<1x1x1xf32>
      %42 = vector.broadcast %41 : f32 to vector<8x128xf32>
      %c0_33 = arith.constant 0 : index
      %c1_34 = arith.constant 1 : index
      %c0_35 = arith.constant 0 : index
      %c0_36 = arith.constant 0 : index
      %43 = vector.load %arg5[%c0_33, %c1_34, %c0_35, %c0_36] : memref<1x2x8x128xf32, #tpu.memory_space<vmem>>, vector<1x1x8x128xf32>
      %44 = vector.shape_cast %43 : vector<1x1x8x128xf32> to vector<8x128xf32>
      %45 = vector.shape_cast %42 : vector<8x128xf32> to vector<1x1x8x128xf32>
      tpu.vector_store %arg5[%c0_33, %c1_34, %c0_35, %c0_36], %45 {strides = array<i32>} : memref<1x2x8x128xf32, #tpu.memory_space<vmem>>, vector<1x1x8x128xf32>,
    } else {
    }
    return
  }
  func.func @transform_0(%arg0: i32, %arg1: i32, %arg2: i32) -> (i32, i32, i32, i32) {
    %c1_i32 = arith.constant 1 : i32
    %0 = arith.muli %arg1, %c1_i32 : i32
    %1 = arith.addi %0, %arg2 : i32
    %c0_i32 = arith.constant 0 : i32
    %c0_i32_0 = arith.constant 0 : i32
    %c0_i32_1 = arith.constant 0 : i32
    return %arg0, %c0_i32, %1, %c0_i32_0 : i32, i32, i32, i32
  }
  func.func @transform_1(%arg0: i32, %arg1: i32, %arg2: i32) -> (i32, i32, i32, i32) {
    %c1_i32 = arith.constant 1 : i32
    %0 = arith.muli %arg1, %c1_i32 : i32
    %1 = arith.addi %0, %arg2 : i32
    %c0_i32 = arith.constant 0 : i32
    %c0_i32_0 = arith.constant 0 : i32
    %c0_i32_1 = arith.constant 0 : i32
    return %arg0, %c0_i32, %1, %c0_i32_0 : i32, i32, i32, i32
  }
  func.func @transform_2(%arg0: i32, %arg1: i32, %arg2: i32) -> (i32, i32, i32, i32) {
    %c1_i32 = arith.constant 1 : i32
    %0 = arith.muli %arg0, %c1_i32 : i32
    %1 = arith.addi %0, %arg1 : i32
    %c0_i32 = arith.constant 0 : i32
    %c0_i32_0 = arith.constant 0 : i32
    %c0_i32_1 = arith.constant 0 : i32
    %c0_i32_2 = arith.constant 0 : i32
    return %1, %c0_i32, %c0_i32_0, %c0_i32_1 : i32, i32, i32, i32
  }
}

</mosaic_0001>

<bundles_post_ra>
// kernel: tpu_custom_call.1
= control target key start
LH: loop header
LB: loop body
LE: loop exit
PB: predicated region body
PF: predicated region fallthrough
CT: control target
= control target key end

     0   :  { %7 = vsyncpa [#allocation5], 0  ;;  %s902_s0 = inlined_call_operand.hbm [shape: f32[2,4,16,16], index: 0, kind: input, shape index: {}]   ;;  %s903_s1 = inlined_call_operand.hbm [shape: f32[2,2,16,16], index: 1, kind: input, shape index: {}]   ;;  %s904_s2 = inlined_call_operand.hbm [shape: f32[2,2,8,128], index: 2, kind: output, shape index: {}]  }
   0x1   :  { %9 = vsyncpa [#allocation5 + $0x1], 0 }
   0x2   :  { %10 = vsyncpa [#allocation8], 0 }
   0x3   :  { %12 = vsyncpa [#allocation8 + $0x1], 0 }
   0x4   :  { %13 = vsyncpa [#allocation6], 0 }
   0x5   :  { %15 = vsyncpa [#allocation6 + $0x1], 0  ;;  %s712_s9 = smov 0   ;;  %s714_s10 = smov 0  }
   0x6   :  { %s716_s11 = smov 0   ;;  %s718_s12 = smov 0  }
   0x7   :  { %s720_s13 = smov 0   ;;  %s722_s14 = smov 0  }
   0x8 LB: > { %s442_s15 = sadd.s32 4294967295, %s687_s14   ;;  %s443_s16 = sadd.s32 4294967294, %s687_s14   ;;  %s687_s14 = sphi %s722_s14, %s21_s14   ;;  %s683_s13 = sphi %s720_s13, %s915_s13   ;;  %s679_s12 = sphi %s718_s12, %s914_s12   ;;  %s675_s11 = sphi %s716_s11, %s913_s11   ;;  %s671_s10 = sphi %s714_s10, %s912_s10   ;;  %s667_s9 = sphi %s712_s9, %s911_s9  }
   0x9   : > { %s40_s17 = sadd.s32 1, %s683_s13  ;;  %s51_s18 = sadd.s32 1, %s675_s11 }
   0xa   : > { %p42_p0 = scmp.ge.s32.totalorder %s40_s17, 2  ;;  %p58_p1 = scmp.ne.s32.totalorder %s675_s11, %s671_s10 }
   0xb   : > { %p59_p2 = scmp.eq.s32.totalorder %s687_s14, 0  ;;  %p64_p3 = scmp.ne.s32.totalorder %s671_s10, %s667_s9 }
   0xc   : > { %s917_s17 = smov (%p42_p0, %s40_s17), 0  ;;  %p65_p5 = scmp.eq.s32.totalorder %s442_s15, 0 }
   0xd   : > { %p753_p4 = por %p59_p2, %p58_p1  ;;  %s46_s20 = ssub.s32 %s683_s13, %s917_s17 }
   0xe   : > { %p120_p6 = scmp.eq.s32.totalorder %s442_s15, 1  ;;  %p49_p7 = scmp.eq.s32.totalorder %s46_s20, 0 }
   0xf   : > { %p759_p8 = por %p65_p5, %p64_p3  ;;  %p126_p10 = scmp.eq.s32.totalorder %s443_s16, 1 }
  0x10   : > { %p763_p9 = por %p120_p6, %p58_p1  ;;  %p445_p12 = scmp.ge.s32.totalorder %s687_s14, 2 }
  0x11   : > { %s768_s23 = scalar_select %p49_p7, %s675_s11, %s51_s18  }
  0x12   : > { %p770_p11 = por %p126_p10, %p64_p3  ;;  %p488_p13 = scmp.lt.s32.totalorder %s687_s14, 2 }
  0x13   : > { %s777_s25 = sand.u32 1, %s675_s11   ;;  %s464_s27 = sshll.u32 %s683_s13, 10 }
  0x14   : > { %s446_s26 = sshll.u32 %s777_s25, 4  ;;  %s159_s30 = scalar_lea.hbm %s902_s0, %s464_s27 }
  0x15   : > { %s150_s3 = scalar_lea.vmem [#allocation4], %s446_s26  ;;  %p786_p0 = pnand %p488_p13, %p753_p4 }
  0x16   : > { %s160_s4 = sshll.u32 %s150_s3, 4  ;;  %p452_p1 = scmp.ge.s32.totalorder %s687_s14, 1  ;;  %s161_s4 = int_to_ptr.vmem [resolvable:$true] %s160_s4 }
  0x17   : > { %s147_s6 = scalar_lea.sflag [#allocation5], %s777_s25  ;;  %p549_p2 = pneg %p786_p0 }
  0x18   : > { %s560_s7 = scalar_lea.vmem %s161_s4, 256  ;;  %s689_s8 = smov [#allocation4]  }
  0x19   : > { %p561_p3 = scmp.ne.s32.totalorder %s161_s4, %s560_s7  ;;  %s565_s15 = sshll.u32 %s689_s8, 4  ;;  %s566_s15 = int_to_ptr.vmem [resolvable:$false] %s565_s15 }
  0x1a   : > { %s567_s16 = scalar_lea.vmem %s566_s15, 512  ;;  %p568_p4 = scmp.lt.s32.totalorder %s161_s4, %s566_s15 }
  0x1b   : > { %p563_p5 = pnand %p561_p3, %p549_p2  ;;  %p569_p7 = scmp.lt.s32.totalorder %s567_s16, %s560_s7 }
  0x1d   : > { %p564_p6 = pneg %p563_p5  ;;  %p570_p10 = por %p569_p7, %p568_p4 }
  0x1f   : > { %p571_p13 = pnand %p570_p10, %p564_p6 }
  0x21   : > { %574 = shalt.err (!%p571_p13)
}
  0x22   : > { %s690_s18 = smov 128   ;;  %s691_s19 = smov 8  }
  0x23   : > { %480 = dma.hbm_to_vmem [thread:$0]  (!%p786_p0), %s159_s30, 256, %s161_s4, %s147_s6, %s690_s18, %s690_s18, %s691_s19  }
  0x24   : > { %p192_p3 = scmp.lt.s32.totalorder %s687_s14, 3  ;;  %s449_s20 = sshll.u32 %s777_s25, 5 }
  0x25   : > { %s465_s26 = sshll.u32 %s683_s13, 9  ;;  %s174_s7 = scalar_lea.vmem [#allocation7], %s449_s20 }
  0x26   : > { %p804_p5 = pnand %p452_p1, %p192_p3  ;;  %s183_s3 = scalar_lea.hbm %s903_s1, %s465_s26 }
  0x27   : > { %s184_s8 = sshll.u32 %s174_s7, 4  ;;  %s171_s15 = scalar_lea.sflag [#allocation8], %s777_s25  ;;  %s185_s8 = int_to_ptr.vmem [resolvable:$true] %s184_s8 }
  0x28   : > { %s588_s16 = scalar_lea.vmem %s185_s8, 512  ;;  %s692_s30 = smov [#allocation7]  }
  0x29   : > { %p589_p6 = scmp.ne.s32.totalorder %s185_s8, %s588_s16  ;;  %s593_s4 = sshll.u32 %s692_s30, 4  ;;  %s594_s4 = int_to_ptr.vmem [resolvable:$false] %s593_s4 }
  0x2a   : > { %s595_s6 = scalar_lea.vmem %s594_s4, 1024  ;;  %p596_p1 = scmp.lt.s32.totalorder %s185_s8, %s594_s4 }
  0x2b   : > { %p591_p4 = pnand %p589_p6, %p549_p2  ;;  %p597_p10 = scmp.lt.s32.totalorder %s595_s6, %s588_s16 }
  0x2d   : > { %p592_p7 = pneg %p591_p4  ;;  %p598_p13 = por %p597_p10, %p596_p1 }
  0x2f   : > { %p599_p3 = pnand %p598_p13, %p592_p7 }
  0x31   : > { %602 = shalt.err (!%p599_p3)
}
  0x32   : > { %483 = dma.hbm_to_vmem [thread:$0]  (!%p786_p0), %s183_s3, 512, %s185_s8, %s171_s15, %s690_s18, %s690_s18, %s691_s19  }
  0x33   : > { %196 = sbr.rel (%p804_p5) target bundleno = 315 (0x13b), region = 28  ;;  %s820_s25 = sand.u32 (!%p804_p5), 1, %s671_s10  }
  0x34   : > { %s453_s20 = sshll.u32 (!%p804_p5), %s820_s25, 4  ;;  %s199_s26 = scalar_lea.sflag (!%p804_p5), [#allocation5], %s820_s25 }
  0x35   : > { %s202_s28 = scalar_lea.vmem (!%p804_p5), [#allocation4], %s453_s20 }
  0x38   : > { %654 = dma.done.wait (%p759_p8), %s199_s26, 256  }
  0x39   : > { %656 = vsyncadd (%p759_p8), %s199_s26, 4294967040  ;;  %s454_s5 = sshll.u32 %s820_s25, 5  ;;  %s208_s18 = scalar_lea.sflag [#allocation8], %s820_s25 }
  0x3a   : > { %s211_s19 = scalar_lea.vmem [#allocation7], %s454_s5 }
  0x3b   : > { %658 = dma.done.wait (%p759_p8), %s208_s18, 512  }
  0x3c   : > { %660 = vsyncadd (%p759_p8), %s208_s18, 4294966784  ;;  %vm246_vm0 = vcmask 130048   ;;  %v693_v0 = vmov 0.0   ;;  %v251_v1 = vld [vmem:[%s211_s19] sm:$0xff]  ;;  %v252_v2 = vld [vmem:[%s211_s19 + $0x8] sm:$0xff]  ;;  %s236_s21 = scalar_lea.vmem [#allocation9], %s453_s20 }
  0x3d   : > { %247 = vst.msk [vmem:[#allocation2] sm:$0xff] %vm246_vm0, %v693_v0  ;;  %248 = vst.msk [vmem:[#allocation3] sm:$0xff] %vm246_vm0, %v693_v0  ;;  %v456_v3 = vld [vmem:[%s211_s19 + $0x10] sm:$0xff]  ;;  %v457_v4 = vld [vmem:[%s211_s19 + $0x18] sm:$0xff]  ;;  %v260_v5 = vadd.f32 1e-10, %v251_v1 }
  0x3e   : > { %v261_v6 = vadd.f32 1e-10, %v252_v2  ;;  %v272_v7 = vsel %vm246_vm0, %v456_v3, 0.0  ;;  %v273_v8 = vsel %vm246_vm0, %v457_v4, 0.0  ;;  %v249_v12 = vld [vmem:[%s202_s28] sm:$0xff]  ;;  %v250_v13 = vld [vmem:[%s202_s28 + $0x8] sm:$0xff] }
  0x3f   : > { %543 = vrcp.f32 %v260_v5  ;;  %v274_v10 = vadd.f32 %v273_v8, %v272_v7  ;;  %v256_v14 = vsub.f32 %v249_v12, %v251_v1  ;;  %v257_v15 = vsub.f32 %v250_v13, %v252_v2  ;;  %s326_s27 = sshll.u32 %s236_s21, 4  ;;  %s466_s3 = sshll.u32 %s679_s12, 8  ;;  %s849_s27 = int_to_ptr.vmem [resolvable:$true] %s326_s27 }
  0x40   : > { %545 = vrcp.f32 %v261_v6  ;;  %s854_s15 = scalar_lea.hbm %s904_s2, %s466_s3  ;;  %s312_s30 = scalar_lea.sflag [#allocation6], %s820_s25 }
  0x41   : > { %v258_v16 = vand.u32 2147483647, %v256_v14  ;;  %v259_v17 = vand.u32 2147483647, %v257_v15  ;;  %s603_s4 = scalar_lea.vmem %s849_s27, 256  ;;  %s694_s12 = smov [#allocation9]  }
  0x42   : > { %p604_p8 = scmp.ne.s32.totalorder %s849_s27, %s603_s4  ;;  %s607_s6 = sshll.u32 %s694_s12, 4  ;;  %s608_s6 = int_to_ptr.vmem [resolvable:$false] %s607_s6 }
  0x43   : > { %s609_s20 = scalar_lea.vmem %s608_s6, 512  ;;  %p610_p5 = scmp.lt.s32.totalorder %s849_s27, %s608_s6 }
  0x44   : > { %v278_v9 = vld [vmem:[#allocation3] sm:$0xff]  ;;  %v275_v26 = vld [vmem:[#allocation2] sm:$0xff]  ;;  %p605_p0 = pnand %p604_p8, %p763_p9  ;;  %p611_p6 = scmp.lt.s32.totalorder %s609_s20, %s603_s4 }
  0x45   : > { %v279_v11 = vadd.f32 %v278_v9, %v274_v10 }
  0x46   : > { %p606_p2 = pneg %p605_p0  ;;  %p612_p4 = por %p611_p6, %p610_p5 }
  0x47   : > { %280 = vst.msk [vmem:[#allocation3] sm:$0xff] %vm246_vm0, %v279_v11 }
  0x48   : > { %p613_p7 = pnand %p612_p4, %p606_p2 }
  0x4c   : > { %v544_v18 = vpop.eup %543 }
  0x4d   : > { %v546_v19 = vpop.eup %545  ;;  %v263_v20 = vmul.f32 %v544_v18, %v258_v16 }
  0x4e   : > { %v265_v21 = vmul.f32 %v546_v19, %v259_v17  ;;  %v297_v30 = vld [vmem:[#allocation3] sm:$0xff] }
  0x4f   : > { %v266_v22 = vmul.f32 %v456_v3, %v263_v20  ;;  %v298_v32 = vsel %vm246_vm0, %v297_v30, 0.0 }
  0x50   : > { %v267_v23 = vmul.f32 %v457_v4, %v265_v21 }
  0x51   : > { %v269_v24 = vsel %vm246_vm0, %v266_v22, 0.0 }
  0x52   : > { %v270_v25 = vsel %vm246_vm0, %v267_v23, 0.0 }
  0x53   : > { %v271_v27 = vadd.f32 %v270_v25, %v269_v24 }
  0x55   : > { %v276_v28 = vadd.f32 %v275_v26, %v271_v27 }
  0x57   : > { %277 = vst.msk [vmem:[#allocation2] sm:$0xff] %vm246_vm0, %v276_v28 }
  0x5e   : > { %v284_v29 = vld [vmem:[#allocation2] sm:$0xff] }
  0x5f   : > { %v285_v31 = vsel %vm246_vm0, %v284_v29, 0.0 }
  0x60   : > { %286 = vadd.xlane.f32.xlu0 %v285_v31 }
  0x64   : > { %299 = vadd.xlane.f32.xlu0 %v298_v32 }
  0xe9   : > { %v287_v33 = vpop.xlane.xlu0 %286 }
  0xea   : > { %v288_v34 = vrot.slane %v287_v33, 4 }
  0xec   : > { %v289_v35 = vadd.f32 %v288_v34, %v287_v33 }
  0xed   : > { %v300_v36 = vpop.xlane.xlu0 %299 }
  0xee   : > { %v290_v37 = vrot.slane %v289_v35, 2  ;;  %v301_v38 = vrot.slane %v300_v36, 4 }
  0xf0   : > { %v302_v39 = vadd.f32 %v301_v38, %v300_v36  ;;  %v291_v40 = vadd.f32 %v290_v37, %v289_v35 }
  0xf2   : > { %v303_v41 = vrot.slane %v302_v39, 2  ;;  %v292_v42 = vrot.slane %v291_v40, 1 }
  0xf4   : > { %v304_v43 = vadd.f32 %v303_v41, %v302_v39  ;;  %v293_v44 = vadd.f32 %v292_v42, %v291_v40 }
  0xf6   : > { %467 = vpush %v293_v44  ;;  %v305_v45 = vrot.slane %v304_v43, 1 }
  0xf8   : > { %v306_v46 = vadd.f32 %v305_v45, %v304_v43 }
  0xfa   : > { %469 = vpush %v306_v46 }
 0x127   : > { %s468_s29 = spop %467 }
 0x128   : > { %v295_v47 = vstv %s468_s29 }
 0x129   : > { %296 = vst [vmem:[%s236_s21] sm:$0xff] %v295_v47 }
 0x12b   : > { %s470_s16 = spop %469 }
 0x12c   : > { %v308_v48 = vstv %s470_s16 }
 0x12d   : > { %458 = vst [vmem:[%s236_s21 + $0x8] sm:$0xff] %v308_v48 }
 0x12e   : > { %616 = shalt.err (!%p613_p7)
}
 0x12f   : > { %s617_s26 = scalar_lea.hbm %s854_s15, 256  ;;  %s621_s18 = scalar_lea.hbm %s904_s2, 512 }
 0x130   : > { %p618_p1 = scmp.ne.s32.totalorder %s854_s15, %s617_s26  ;;  %p622_p3 = scmp.lt.s32.totalorder %s854_s15, %s904_s2 }
 0x131   : > { %p623_p8 = scmp.lt.s32.totalorder %s621_s18, %s617_s26 }
 0x132   : > { %p619_p10 = pnand %p618_p1, %p763_p9 }
 0x133   : > { %p624_p0 = por %p623_p8, %p622_p3 }
 0x134   : > { %p620_p13 = pneg %p619_p10 }
 0x136   : > { %p625_p2 = pnand %p624_p0, %p620_p13 }
 0x138   : > { %628 = shalt.err (!%p625_p2)
}
 0x139   : > { %s695_s29 = smov 128   ;;  %s696_s3 = smov 8  }
 0x13a   : > { %475 = dma.vmem_to_hbm [thread:$0]  (%p763_p9), %s849_s27, 256, %s854_s15, %s312_s30, %s695_s29, %s695_s29, %s696_s3  }
 0x13b PF: > { %s341_s7 = sand.u32 1, %s667_s9   ;;  %p485_p5 = pnand %p445_p12, %p770_p11 }
 0x13c   : > { %s342_s8 = scalar_lea.sflag [#allocation6], %s341_s7 }
 0x13d   : > { %p486_p6 = pneg %p485_p5 }
 0x13f   : > { %662 = dma.done.wait (%p486_p6), %s342_s8, 256  }
 0x140   : > { %664 = vsyncadd (%p486_p6), %s342_s8, 4294967040  ;;  %s21_s14 = sadd.s32 1, %s687_s14   ;;  %s911_s9 = smov %s671_s10 }
 0x141   : > { %p18_p4 = scmp.ge.s32.totalorder %s21_s14, 4   ;;  %s912_s10 = smov %s675_s11 }
 0x142   : > { %s913_s11 = smov %s768_s23  ;;  %s914_s12 = smov %s683_s13 }
 0x143   : > { %s915_s13 = smov %s917_s17  ;;  %20 = sbr.rel (!%p18_p4) target bundleno = 8 (0x8), region = 96 }
 0x148   :  { %347 = vsyncpa [#allocation5], 1 }
 0x149   :  { %349 = vsyncpa [#allocation5 + $0x1], 1 }
 0x14a   :  { %350 = vsyncpa [#allocation8], 1 }
 0x14b   :  { %352 = vsyncpa [#allocation8 + $0x1], 1 }
 0x14c   :  { %353 = vsyncpa [#allocation6], 1 }
 0x14d   :  { %355 = vsyncpa [#allocation6 + $0x1], 1 }

</bundles_post_ra>
